<compile_context>
chip_gen: v7x
topology: tpu7x:2x2x1
jax: 0.10.0
libtpu: 0.0.40
codegen_flags: <defaults>
</compile_context>

<pallas_src>
import jax
import jax.numpy as jnp
from jax.experimental import pallas as pl
from jax.experimental.pallas import tpu as pltpu


def _fa_loss_kernel(ti_ref, tj_ref, w_ref, det_i_ref, det_j_ref,
                    sr_i_ref, sr_j_ref, out_ref):
    """Grid = (split, batch, tile-pair).

    ti_ref/tj_ref/w_ref  : (n_splits, t_split) int32 SMEM prefetch tables
                           (ti/tj only used by the index_maps; w in-kernel)
    det_i_ref / sr_i_ref : (1, C, TILE) pre-normalized row-pixel feature tile
    det_j_ref / sr_j_ref : (1, C, TILE) pre-normalized col-pixel feature tile
    out_ref              : (1, 1, TILE, TILE) per-(split, batch) partial sum
    """
    s = pl.program_id(0)
    t = pl.program_id(2)

    @pl.when(t == 0)
    def _():
        out_ref[...] = jnp.zeros_like(out_ref)

    # Gram tile of unit-norm features == cosine tile.  Contract the channel
    # axis (dim 0 of both operands) directly on the MXU; accumulate in f32.
    dims = (((0,), (0,)), ((), ()))
    cos_det = jax.lax.dot_general(det_i_ref[0], det_j_ref[0], dims,
                                  preferred_element_type=jnp.float32)
    cos_sr = jax.lax.dot_general(sr_i_ref[0], sr_j_ref[0], dims,
                                 preferred_element_type=jnp.float32)
    diff = jnp.abs(cos_det - cos_sr)                      # (TILE, TILE)

    # Prefetched weight: 1 on diagonal tile pairs, 2 off-diagonal (symmetry),
    # 0 on padding pairs introduced by the split of the tile-pair axis.
    w = w_ref[s, t].astype(jnp.float32)
    out_ref[0, 0] = out_ref[0, 0] + w * diff


def _vmem_budget_bytes():
    """Usable VMEM budget: 3/4 of the chip's capacity, capped; safe fallback."""
    try:
        info = pltpu.get_tpu_info()
        cap = int(getattr(info, "vmem_capacity_bytes", 0) or 0)
        if cap > 0:
            return min((cap * 3) // 4, 100 * 1024 * 1024)
    except Exception:
        pass
    return 48 * 1024 * 1024     # safe everywhere (v7x has 64 MiB per TC)


def _pick_tile(n, c, itemsize, budget, tile_cap):
    """Largest multiple-of-128 tile whose working set fits the VMEM budget."""
    n128 = ((n + 127) // 128) * 128
    cap = min(tile_cap, n128)
    best = 128
    t = 128
    while t <= cap:
        # 4 input specs x 2 pipeline buffers, resident f32 accumulator (x2 for
        # safety) plus ~3 TILE^2 f32 intermediates (cos_det, cos_sr, diff) and
        # 2 MiB of general headroom.
        need = 4 * 2 * c * t * itemsize + 5 * t * t * 4 + (2 << 20)
        if need <= budget:
            best = t
        t += 128
    return best


def fa_loss_pallas(det, sr, use_subsample=True, loss_weight=1.0,
                   tile_n=1024, cast_to_bf16=False):
    """FALoss forward (reduction='mean', weight=None, avg_factor=None)."""
    # TODO(synk): 'none'/'sum' reductions, per-sample weight and avg_factor of
    # the mmdet @weighted_loss wrapper are not implemented (default path only).
    if use_subsample:
        # F.interpolate(scale_factor=1/8, mode='nearest') picks src index
        # floor(dst*8): stride-8 subsample, floor(H/8) x floor(W/8) outputs.
        H, W = det.shape[2], det.shape[3]
        hs, ws = max(H // 8, 1), max(W // 8, 1)
        det = det[:, :, : hs * 8 : 8, : ws * 8 : 8]
        sr = sr[:, :, : hs * 8 : 8, : ws * 8 : 8]

    B, C, H, W = det.shape
    N = H * W

    # Hoist all normalization out of the kernel: L2-normalize each pixel once
    # (instead of re-deriving per-tile norms up to nt times inside the kernel).
    # A zero-norm pixel yields NaN, matching the 0/inf behavior of the torch ref.
    def normalize(x):
        xf = x.reshape(B, C, N).astype(jnp.float32)
        norm = jnp.sqrt(jnp.sum(xf * xf, axis=1, keepdims=True))   # (B, 1, N)
        return xf / norm

    det_n = normalize(det)
    sr_n = normalize(sr)

    use_bf16 = bool(cast_to_bf16) or det.dtype == jnp.bfloat16
    feat_dtype = jnp.bfloat16 if use_bf16 else jnp.float32
    det_n = det_n.astype(feat_dtype)
    sr_n = sr_n.astype(feat_dtype)
    itemsize = jnp.dtype(feat_dtype).itemsize

    # Tile selection from the per-generation VMEM budget, then pad the pixel
    # axis up to a tile multiple (padded pixels are exactly zero -> cos rows /
    # cols are 0 in BOTH det and sr -> contribute 0 to the diff sum).
    budget = _vmem_budget_bytes()
    tile = _pick_tile(N, C, itemsize, budget, tile_n)
    n_pad = ((N + tile - 1) // tile) * tile
    if n_pad > N:
        pad = n_pad - N
        det_n = jnp.pad(det_n, ((0, 0), (0, 0), (0, pad)))
        sr_n = jnp.pad(sr_n, ((0, 0), (0, 0), (0, pad)))

    nt = n_pad // tile
    pairs = [(i, j) for i in range(nt) for j in range(i, nt)]   # upper triangle
    T = len(pairs)

    # Batch axis is the parallel axis; with B == 1 (common for this loss) split
    # the tile-pair reduction into 2 independent accumulator slabs so both
    # TensorCores of a 2-TC part (v7x) have work.
    n_splits = 2 if (B == 1 and T >= 2) else 1
    t_split = -(-T // n_splits)
    total = n_splits * t_split
    ti = [p[0] for p in pairs] + [0] * (total - T)
    tj = [p[1] for p in pairs] + [0] * (total - T)
    wt = [1 if p[0] == p[1] else 2 for p in pairs] + [0] * (total - T)
    ti_idx = jnp.asarray(ti, dtype=jnp.int32).reshape(n_splits, t_split)
    tj_idx = jnp.asarray(tj, dtype=jnp.int32).reshape(n_splits, t_split)
    w_arr = jnp.asarray(wt, dtype=jnp.int32).reshape(n_splits, t_split)

    # Advisory cost: upper-triangle-only matmul flops; i-tiles are only
    # re-fetched when the row-block index changes (~nt times per batch).
    cost = pl.CostEstimate(
        flops=int(4 * B * C * tile * tile * total),
        transcendentals=0,
        bytes_accessed=int(2 * B * total * C * tile * itemsize      # j tiles
                           + 2 * B * nt * C * tile * itemsize       # i tiles
                           + n_splits * B * tile * tile * 4),        # output
    )

    def i_map(s, b, t, ti_r, tj_r, w_r):
        return (b, 0, ti_r[s, t])

    def j_map(s, b, t, ti_r, tj_r, w_r):
        return (b, 0, tj_r[s, t])

    def o_map(s, b, t, ti_r, tj_r, w_r):
        return (s, b, 0, 0)

    part_sums = pl.pallas_call(
        _fa_loss_kernel,
        out_shape=jax.ShapeDtypeStruct((n_splits, B, tile, tile), jnp.float32),
        grid_spec=pltpu.PrefetchScalarGridSpec(
            num_scalar_prefetch=3,
            grid=(n_splits, B, t_split),
            in_specs=[
                pl.BlockSpec((1, C, tile), i_map),   # det row tile
                pl.BlockSpec((1, C, tile), j_map),   # det col tile
                pl.BlockSpec((1, C, tile), i_map),   # sr  row tile
                pl.BlockSpec((1, C, tile), j_map),   # sr  col tile
            ],
            out_specs=pl.BlockSpec((1, 1, tile, tile), o_map),
        ),
        compiler_params=pltpu.CompilerParams(
            dimension_semantics=("parallel", "parallel", "arbitrary"),
            vmem_limit_bytes=int(budget),
        ),
        cost_estimate=cost,
    )(ti_idx, tj_idx, w_arr, det_n, det_n, sr_n, sr_n)

    # L1Loss 'mean' over the ORIGINAL (B, N, N) elements, then loss_weight.
    return jnp.sum(part_sums) / (B * N * N) * loss_weight


def _fa_loss_ref(det, sr, use_subsample=True, loss_weight=1.0):
    """Pure-JAX reference mirroring the PyTorch code, for verification."""
    if use_subsample:
        H, W = det.shape[2], det.shape[3]
        hs, ws = max(H // 8, 1), max(W // 8, 1)
        det = det[:, :, : hs * 8 : 8, : ws * 8 : 8]
        sr = sr[:, :, : hs * 8 : 8, : ws * 8 : 8]

    def sim(feat):
        B, C, Hs, Ws = feat.shape
        Fi = feat.reshape(B, C, Hs * Ws).astype(jnp.float32)
        Fj = jnp.transpose(Fi, (0, 2, 1))
        SM = jnp.einsum('bnc,bcm->bnm', Fj, Fi)
        Fi_p2 = jnp.linalg.norm(Fi, axis=1)[:, None, :]
        Fj_p2 = jnp.linalg.norm(Fj, axis=2)[:, :, None]
        return SM / (Fj_p2 * Fi_p2)

    return jnp.mean(jnp.abs(sim(det) - sim(sr))) * loss_weight


if __name__ == "__main__":
    key = jax.random.PRNGKey(0)
    k1, k2, k3, k4, k5, k6 = jax.random.split(key, 6)

    # Case 1: module-consistent small shapes (16x16 -> 2x2 after 1/8 subsample;
    # N=4 padded to a single 128-wide tile).
    det = jax.random.normal(k1, (2, 4, 16, 16), dtype=jnp.float32)
    sr = jax.random.normal(k2, (2, 4, 16, 16), dtype=jnp.float32)
    loss = fa_loss_pallas(det, sr, use_subsample=True, loss_weight=1.0)
    jax.block_until_ready(loss)
    ref = _fa_loss_ref(det, sr, use_subsample=True, loss_weight=1.0)
    assert jnp.allclose(loss, ref, rtol=1e-4, atol=1e-6), (loss, ref)

    # Case 2: tiled upper-triangle path with B=2
    # (128x128 -> 16x16 -> N=256, forced tile=128 -> 3 tile pairs, weight-2).
    det2 = jax.random.normal(k3, (2, 8, 128, 128), dtype=jnp.float32)
    sr2 = jax.random.normal(k4, (2, 8, 128, 128), dtype=jnp.float32)
    loss2 = fa_loss_pallas(det2, sr2, use_subsample=True, loss_weight=0.5,
                           tile_n=128)
    jax.block_until_ready(loss2)
    ref2 = _fa_loss_ref(det2, sr2, use_subsample=True, loss_weight=0.5)
    assert jnp.allclose(loss2, ref2, rtol=1e-4, atol=1e-6), (loss2, ref2)

    # Case 3: N not a multiple of 128 (120x136 -> 15x17 -> N=255, padded to 256)
    # plus the B=1 split path (2 parallel accumulator slabs, 1 zero-weight pad).
    det3 = jax.random.normal(k5, (1, 8, 120, 136), dtype=jnp.float32)
    sr3 = jax.random.normal(k6, (1, 8, 120, 136), dtype=jnp.float32)
    loss3 = fa_loss_pallas(det3, sr3, use_subsample=True, loss_weight=1.0,
                           tile_n=128)
    jax.block_until_ready(loss3)
    ref3 = _fa_loss_ref(det3, sr3, use_subsample=True, loss_weight=1.0)
    assert jnp.allclose(loss3, ref3, rtol=1e-4, atol=1e-6), (loss3, ref3)

    print("KERNEL_OK")
</pallas_src>

<mosaic_0001>
module attributes {stable_mosaic.version = 11 : i64} {
  func.func @_fa_loss_kernel(%arg0: i32, %arg1: i32, %arg2: i32, %arg3: memref<1x1xi32, #tpu.memory_space<smem>>, %arg4: memref<1x1xi32, #tpu.memory_space<smem>>, %arg5: memref<1x1xi32, #tpu.memory_space<smem>>, %arg6: memref<1x4x128xf32, #tpu.memory_space<vmem>>, %arg7: memref<1x4x128xf32, #tpu.memory_space<vmem>>, %arg8: memref<1x4x128xf32, #tpu.memory_space<vmem>>, %arg9: memref<1x4x128xf32, #tpu.memory_space<vmem>>, %arg10: memref<1x1x128x128xf32, #tpu.memory_space<vmem>>) attributes {dimension_semantics = [#tpu.dimension_semantics<parallel>, #tpu.dimension_semantics<parallel>, #tpu.dimension_semantics<arbitrary>], iteration_bounds = array<i64: 1, 2, 1>, scalar_prefetch = 3 : i64, scratch_operands = 0 : i64, tpu.core_type = #tpu.core_type<tc>, window_params = [{transform_indices = @transform_0, window_bounds = array<i64: 1, 4, 128>}, {transform_indices = @transform_1, window_bounds = array<i64: 1, 4, 128>}, {transform_indices = @transform_2, window_bounds = array<i64: 1, 4, 128>}, {transform_indices = @transform_3, window_bounds = array<i64: 1, 4, 128>}, {transform_indices = @transform_4, window_bounds = array<i64: 1, 1, 128, 128>}]} {
    %c0_i32 = arith.constant 0 : i32
    %0 = arith.cmpi eq, %arg2, %c0_i32 : i32
    %1 = arith.extui %0 : i1 to i32
    %c0_i32_0 = arith.constant 0 : i32
    %2 = arith.cmpi ne, %1, %c0_i32_0 : i32
    scf.if %2 {
      %cst_21 = arith.constant 0.000000e+00 : f32
      %27 = vector.broadcast %cst_21 : f32 to vector<1x1x128x128xf32>
      %c0_22 = arith.constant 0 : index
      %c0_23 = arith.constant 0 : index
      %c0_24 = arith.constant 0 : index
      %c0_25 = arith.constant 0 : index
      %28 = vector.load %arg10[%c0_22, %c0_23, %c0_24, %c0_25] : memref<1x1x128x128xf32, #tpu.memory_space<vmem>>, vector<1x1x128x128xf32>
      tpu.vector_store %arg10[%c0_22, %c0_23, %c0_24, %c0_25], %27 {strides = array<i32>} : memref<1x1x128x128xf32, #tpu.memory_space<vmem>>, vector<1x1x128x128xf32>,
    } else {
    }
    %c0 = arith.constant 0 : index
    %c0_1 = arith.constant 0 : index
    %c0_2 = arith.constant 0 : index
    %3 = vector.load %arg6[%c0, %c0_1, %c0_2] : memref<1x4x128xf32, #tpu.memory_space<vmem>>, vector<1x4x128xf32>
    %4 = vector.shape_cast %3 : vector<1x4x128xf32> to vector<4x128xf32>
    %c0_3 = arith.constant 0 : index
    %c0_4 = arith.constant 0 : index
    %c0_5 = arith.constant 0 : index
    %5 = vector.load %arg7[%c0_3, %c0_4, %c0_5] : memref<1x4x128xf32, #tpu.memory_space<vmem>>, vector<1x4x128xf32>
    %6 = vector.shape_cast %5 : vector<1x4x128xf32> to vector<4x128xf32>
    %cst = arith.constant dense<0.000000e+00> : vector<128x128xf32>
    %7 = tpu.matmul %4, %6, %cst {dimension_numbers = #tpu.dot_dimension_numbers<[0], [0], [1], [1], [0, 1, 1, 1], [], []>} : vector<4x128xf32>, vector<4x128xf32>, vector<128x128xf32> -> vector<128x128xf32>
    %c0_6 = arith.constant 0 : index
    %c0_7 = arith.constant 0 : index
    %c0_8 = arith.constant 0 : index
    %8 = vector.load %arg8[%c0_6, %c0_7, %c0_8] : memref<1x4x128xf32, #tpu.memory_space<vmem>>, vector<1x4x128xf32>
    %9 = vector.shape_cast %8 : vector<1x4x128xf32> to vector<4x128xf32>
    %c0_9 = arith.constant 0 : index
    %c0_10 = arith.constant 0 : index
    %c0_11 = arith.constant 0 : index
    %10 = vector.load %arg9[%c0_9, %c0_10, %c0_11] : memref<1x4x128xf32, #tpu.memory_space<vmem>>, vector<1x4x128xf32>
    %11 = vector.shape_cast %10 : vector<1x4x128xf32> to vector<4x128xf32>
    %cst_12 = arith.constant dense<0.000000e+00> : vector<128x128xf32>
    %12 = tpu.matmul %9, %11, %cst_12 {dimension_numbers = #tpu.dot_dimension_numbers<[0], [0], [1], [1], [0, 1, 1, 1], [], []>} : vector<4x128xf32>, vector<4x128xf32>, vector<128x128xf32> -> vector<128x128xf32>
    %13 = arith.subf %7, %12 : vector<128x128xf32>
    %14 = math.absf %13 : vector<128x128xf32>
    %15 = arith.index_cast %arg0 : i32 to index
    %16 = arith.index_cast %arg2 : i32 to index
    %17 = memref.load %arg5[%15, %16] : memref<1x1xi32, #tpu.memory_space<smem>>
    %18 = arith.sitofp %17 : i32 to f32
    %c0_13 = arith.constant 0 : index
    %c0_14 = arith.constant 0 : index
    %c0_15 = arith.constant 0 : index
    %c0_16 = arith.constant 0 : index
    %19 = vector.load %arg10[%c0_13, %c0_14, %c0_15, %c0_16] : memref<1x1x128x128xf32, #tpu.memory_space<vmem>>, vector<1x1x128x128xf32>
    %20 = vector.shape_cast %19 : vector<1x1x128x128xf32> to vector<128x128xf32>
    %21 = vector.broadcast %18 : f32 to vector<128x128xf32>
    %22 = arith.mulf %21, %14 : vector<128x128xf32>
    %23 = arith.addf %20, %22 : vector<128x128xf32>
    %c0_17 = arith.constant 0 : index
    %c0_18 = arith.constant 0 : index
    %c0_19 = arith.constant 0 : index
    %c0_20 = arith.constant 0 : index
    %24 = vector.load %arg10[%c0_17, %c0_18, %c0_19, %c0_20] : memref<1x1x128x128xf32, #tpu.memory_space<vmem>>, vector<1x1x128x128xf32>
    %25 = vector.shape_cast %24 : vector<1x1x128x128xf32> to vector<128x128xf32>
    %26 = vector.shape_cast %23 : vector<128x128xf32> to vector<1x1x128x128xf32>
    tpu.vector_store %arg10[%c0_17, %c0_18, %c0_19, %c0_20], %26 {strides = array<i32>} : memref<1x1x128x128xf32, #tpu.memory_space<vmem>>, vector<1x1x128x128xf32>,
    return
  }
  func.func @transform_0(%arg0: i32, %arg1: i32, %arg2: i32, %arg3: memref<1x1xi32, #tpu.memory_space<smem>>, %arg4: memref<1x1xi32, #tpu.memory_space<smem>>, %arg5: memref<1x1xi32, #tpu.memory_space<smem>>) -> (i32, i32, i32) {
    %0 = arith.index_cast %arg0 : i32 to index
    %1 = arith.index_cast %arg2 : i32 to index
    %2 = memref.load %arg3[%0, %1] : memref<1x1xi32, #tpu.memory_space<smem>>
    %c0_i32 = arith.constant 0 : i32
    %c0_i32_0 = arith.constant 0 : i32
    return %arg1, %c0_i32, %2 : i32, i32, i32
  }
  func.func @transform_1(%arg0: i32, %arg1: i32, %arg2: i32, %arg3: memref<1x1xi32, #tpu.memory_space<smem>>, %arg4: memref<1x1xi32, #tpu.memory_space<smem>>, %arg5: memref<1x1xi32, #tpu.memory_space<smem>>) -> (i32, i32, i32) {
    %0 = arith.index_cast %arg0 : i32 to index
    %1 = arith.index_cast %arg2 : i32 to index
    %2 = memref.load %arg4[%0, %1] : memref<1x1xi32, #tpu.memory_space<smem>>
    %c0_i32 = arith.constant 0 : i32
    %c0_i32_0 = arith.constant 0 : i32
    return %arg1, %c0_i32, %2 : i32, i32, i32
  }
  func.func @transform_2(%arg0: i32, %arg1: i32, %arg2: i32, %arg3: memref<1x1xi32, #tpu.memory_space<smem>>, %arg4: memref<1x1xi32, #tpu.memory_space<smem>>, %arg5: memref<1x1xi32, #tpu.memory_space<smem>>) -> (i32, i32, i32) {
    %0 = arith.index_cast %arg0 : i32 to index
    %1 = arith.index_cast %arg2 : i32 to index
    %2 = memref.load %arg3[%0, %1] : memref<1x1xi32, #tpu.memory_space<smem>>
    %c0_i32 = arith.constant 0 : i32
    %c0_i32_0 = arith.constant 0 : i32
    return %arg1, %c0_i32, %2 : i32, i32, i32
  }
  func.func @transform_3(%arg0: i32, %arg1: i32, %arg2: i32, %arg3: memref<1x1xi32, #tpu.memory_space<smem>>, %arg4: memref<1x1xi32, #tpu.memory_space<smem>>, %arg5: memref<1x1xi32, #tpu.memory_space<smem>>) -> (i32, i32, i32) {
    %0 = arith.index_cast %arg0 : i32 to index
    %1 = arith.index_cast %arg2 : i32 to index
    %2 = memref.load %arg4[%0, %1] : memref<1x1xi32, #tpu.memory_space<smem>>
    %c0_i32 = arith.constant 0 : i32
    %c0_i32_0 = arith.constant 0 : i32
    return %arg1, %c0_i32, %2 : i32, i32, i32
  }
  func.func @transform_4(%arg0: i32, %arg1: i32, %arg2: i32, %arg3: memref<1x1xi32, #tpu.memory_space<smem>>, %arg4: memref<1x1xi32, #tpu.memory_space<smem>>, %arg5: memref<1x1xi32, #tpu.memory_space<smem>>) -> (i32, i32, i32, i32) {
    %c0_i32 = arith.constant 0 : i32
    %c0_i32_0 = arith.constant 0 : i32
    %c0_i32_1 = arith.constant 0 : i32
    return %arg0, %arg1, %c0_i32, %c0_i32_0 : i32, i32, i32, i32
  }
}

</mosaic_0001>

<bundles_post_ra>
// kernel: tpu_custom_call.1
= control target key start
LH: loop header
LB: loop body
LE: loop exit
PB: predicated region body
PF: predicated region fallthrough
CT: control target
= control target key end

     0   :  { %s2182_s0 = inlined_call_operand.<no memory space> [shape: s32[1,1], index: 0, kind: input, shape index: {}]   ;;  %s2183_s1 = inlined_call_operand.<no memory space> [shape: s32[1,1], index: 1, kind: input, shape index: {}]   ;;  %s2184_s2 = inlined_call_operand.<no memory space> [shape: s32[1,1], index: 2, kind: input, shape index: {}]   ;;  %s2185_s3 = inlined_call_operand.vmem [shape: f32[2,4,128], index: 3, kind: input, shape index: {}]   ;;  %s2186_s4 = inlined_call_operand.hbm [shape: f32[2,4,128], index: 4, kind: input, shape index: {}]   ;;  %s2187_s5 = inlined_call_operand.vmem [shape: f32[2,4,128], index: 5, kind: input, shape index: {}]   ;;  %s2188_s6 = inlined_call_operand.hbm [shape: f32[2,4,128], index: 6, kind: input, shape index: {}]   ;;  %s2189_s7 = inlined_call_operand.hbm [shape: f32[1,2,128,128], index: 7, kind: output, shape index: {}]  }
   0x1   :  { %2199 = sst [smem:[#allocation20_spill]] %s2186_s4 }
   0x2   :  { %12 = sst [smem:[#allocation3]] %s2182_s0 }
   0x3   :  { %13 = sst [smem:[#allocation4]] %s2183_s1 }
   0x4   :  { %14 = sst [smem:[#allocation5]] %s2184_s2 }
   0x5   :  { %15 = vsyncpa [#allocation7], 0 }
   0x6   :  { %17 = vsyncpa [#allocation7 + $0x1], 0 }
   0x7   :  { %18 = vsyncpa [#allocation10], 0 }
   0x8   :  { %20 = vsyncpa [#allocation10 + $0x1], 0 }
   0x9   :  { %21 = vsyncpa [#allocation8], 0 }
   0xa   :  { %23 = vsyncpa [#allocation8 + $0x1], 0  ;;  %s1769_s30 = smov 0   ;;  %s1771_s8 = smov 0  }
   0xb   :  { %s1773_s9 = smov 0   ;;  %s1775_s0 = smov 0  }
   0xc   :  { %s1777_s10 = smov 0   ;;  %s1779_s1 = smov 0  }
   0xd   :  { %s1781_s11 = smov 0   ;;  %s1783_s2 = smov 0  }
   0xe   :  { %s1785_s12 = smov 0   ;;  %s1787_s13 = smov 0  }
   0xf   :  { %s1789_s14 = smov 0   ;;  %s1791_s15 = smov 0  }
  0x10 LB: > { %2200 = sst [smem:[#allocation15_spill]] %s1677_s9  ;;  %s1261_s16 = sadd.s32 4294967295, %s1713_s15   ;;  %s1713_s15 = sphi %s1791_s15, %s29_s15   ;;  %s1709_s14 = sphi %s1789_s14, %s2230_s14   ;;  %s1705_s13 = sphi %s1787_s13, %s2239_s13   ;;  %s1701_s12 = sphi %s1785_s12, %s2238_s12   ;;  %s1697_s2 = sphi %s1783_s2, %s2237_s2   ;;  %s1693_s11 = sphi %s1781_s11, %s2236_s11   ;;  %s1689_s1 = sphi %s1779_s1, %s2235_s1   ;;  %s1685_s10 = sphi %s1777_s10, %s2234_s10   ;;  %s1681_s0 = sphi %s1775_s0, %s2233_s0   ;;  %s1677_s9 = sphi %s1773_s9, %s2227_s9   ;;  %s1673_s8 = sphi %s1771_s8, %s2232_s8   ;;  %s1669_s30 = sphi %s1769_s30, %s2231_s30  }
  0x11   : > { %2201 = sst [smem:[#allocation16_spill]] %s1709_s14  ;;  %s1262_s17 = sadd.s32 4294967294, %s1713_s15  }
  0x12   : > { %s44_s18 = sadd.s32 1, %s1709_s14  ;;  %s103_s19 = sld [smem:[#allocation4]] }
  0x13   : > { %p46_p0 = scmp.ge.s32.totalorder %s44_s18, 2  ;;  %s117_s20 = sadd.s32 1, %s1701_s12 }
  0x14   : > { %p124_p1 = scmp.ne.s32.totalorder %s1701_s12, %s1697_s2  ;;  %p2192_p2 = scmp.eq.s32.totalorder %s1713_s15, 0 }
  0x15   : > { %s2241_s18 = smov (%p46_p0, %s44_s18), 0  ;;  %p130_p4 = scmp.ne.s32.totalorder %s1697_s2, %s1693_s11 }
  0x16   : > { %2202 = sst [smem:[#allocation17_spill]] %s2241_s18  ;;  %p1838_p3 = por %p2192_p2, %p124_p1 }
  0x17   : > { %s112_s22 = ssub.s32 %s1709_s14, %s2241_s18  ;;  %p1845_p5 = scmp.eq.s32.totalorder %s1261_s16, 0 }
  0x18   : > { %p1849_p6 = scmp.eq.s32.totalorder %s112_s22, 0  ;;  %s233_s26 = sadd.s32 1, %s1677_s9 }
  0x19   : > { %s2204_s23 = scalar_select %p1845_p5, 1, 0 }
  0x1a   : > { %p1855_p7 = por %p1845_p5, %p130_p4  ;;  %p243_p8 = scmp.ne.s32.totalorder %s1677_s9, %s1673_s8 }
  0x1b   : > { %s1863_s27 = scalar_select %p1849_p6, %s1677_s9, %s233_s26  }
  0x1c   : > { %s2206_s25 = scalar_select %p1855_p7, 1, 0 }
  0x1d   : > { %2207 = sst [smem:[#allocation18_spill]] %s1863_s27  ;;  %p244_p9 = scmp.eq.s32.totalorder %s1261_s16, 1 }
  0x1e   : > { %s1868_s28 = scalar_select %p1849_p6, %s1701_s12, %s117_s20  }
  0x1f   : > { %p249_p10 = scmp.ne.s32.totalorder %s1673_s8, %s1669_s30  ;;  %p250_p11 = scmp.eq.s32.totalorder %s1262_s17, 1 }
  0x20   : > { %2208 = sst [smem:[#allocation19_spill]] %s1868_s28  ;;  %p1874_p12 = por %p244_p9, %p243_p8 }
  0x21   : > { %p1879_p0 = por %p250_p11, %p249_p10  ;;  %p2194_p1 = scmp.lt.s32.totalorder %s1713_s15, 2 }
  0x22   : > { %s2209_s29 = scalar_select %p1874_p12, 1, 0 }
  0x23   : > { %s2210_s11 = scalar_select %p1879_p0, 1, 0 }
  0x24   : > { %s296_s20 = sand.u32 1, %s1701_s12   ;;  %s312_s22 = sadd.s32 %s1709_s14, %s103_s19 }
  0x25   : > { %s1265_s26 = sshll.u32 %s296_s20, 2  ;;  %s1886_s18 = sshll.u32 %s312_s22, 6 }
  0x26   : > { %s2211_s4 = sld [smem:[#allocation20_spill]]  ;;  %s300_s27 = scalar_lea.vmem [#allocation6], %s1265_s26 }
  0x27   : > { %s316_s9 = sshll.u32 %s300_s27, 4  ;;  %p1900_p4 = pnand %p2194_p1, %p1838_p3  ;;  %s1894_s9 = int_to_ptr.vmem [resolvable:$true] %s316_s9 }
  0x28   : > { %s297_s28 = scalar_lea.sflag [#allocation7], %s296_s20 }
  0x29   : > { %p1521_p11 = pneg %p1900_p4 }
  0x2c   : > { %s1892_s17 = scalar_lea.hbm %s2211_s4, %s1886_s18  ;;  %s1524_s26 = scalar_lea.hbm %s2211_s4, 128 }
  0x2d   : > { %s1519_s22 = scalar_lea.hbm %s1892_s17, 64  ;;  %p1525_p3 = scmp.lt.u32.totalorder %s1892_s17, %s2211_s4 }
  0x2e   : > { %p1520_p10 = scmp.ne.s32.totalorder %s1892_s17, %s1519_s22  ;;  %p1526_p1 = scmp.lt.u32.totalorder %s1524_s26, %s1519_s22 }
  0x2f   : > { %p1528_p9 = scmp.lt.u32.totalorder %s1519_s22, %s1892_s17 }
  0x30   : > { %p1522_p13 = pnand %p1521_p11, %p1520_p10  ;;  %p1527_p8 = por %p1526_p1, %p1525_p3 }
  0x32   : > { %p1523_p2 = pneg %p1522_p13  ;;  %p1529_p0 = por %p1528_p9, %p1527_p8 }
  0x34   : > { %p1530_p12 = pnand %p1529_p0, %p1523_p2 }
  0x36   : > { %1533 = shalt.err (!%p1530_p12)
}
  0x37   : > { %s1534_s20 = scalar_lea.vmem %s1894_s9, 64  ;;  %s1715_s27 = smov [#allocation6]  }
  0x38   : > { %p1535_p13 = scmp.ne.s32.totalorder %s1894_s9, %s1534_s20  ;;  %s1539_s21 = sshll.u32 %s1715_s27, 4  ;;  %s1540_s21 = int_to_ptr.vmem [resolvable:$false] %s1539_s21 }
  0x39   : > { %s1541_s14 = scalar_lea.vmem %s1540_s21, 128  ;;  %p1542_p5 = scmp.lt.s32.totalorder %s1894_s9, %s1540_s21 }
  0x3a   : > { %p1537_p10 = pnand %p1535_p13, %p1521_p11  ;;  %p1543_p1 = scmp.lt.s32.totalorder %s1541_s14, %s1534_s20 }
  0x3c   : > { %p1538_p7 = pneg %p1537_p10  ;;  %p1544_p3 = por %p1543_p1, %p1542_p5 }
  0x3e   : > { %p1545_p8 = pnand %p1544_p3, %p1538_p7 }
  0x40   : > { %1548 = shalt.err (!%p1545_p8)
}
  0x41   : > { %1410 = dma.hbm_to_vmem [thread:$0]  (!%p1900_p4), %s1892_s17, 64, %s1894_s9, %s297_s28  }
  0x42   : > { %p2213_p2 = scmp.lt.s32.totalorder %s1713_s15, 3  ;;  %p2214_p5 = scmp.ge.s32.totalorder %s1713_s15, 1 }
  0x43   : > { %s205_s22 = sadd.s32 1, %s1689_s1  ;;  %p212_p12 = scmp.ne.s32.totalorder %s1689_s1, %s1685_s10 }
  0x44   : > { %p1935_p7 = pnand %p2214_p5, %p2213_p2  ;;  %p2216_p0 = scmp.eq.s32.totalorder %s1713_s15, 0 }
  0x45   : > { %s1945_s26 = scalar_select %p1849_p6, %s1689_s1, %s205_s22  }
  0x46   : > { %p214_p9 = por %p212_p12, %p2216_p0  ;;  %p218_p11 = scmp.ne.s32.totalorder %s1685_s10, %s1681_s0 }
  0x47   : > { %s349_s16 = sand.u32 1, %s1689_s1   ;;  %p2217_p13 = scmp.ne.s32.totalorder %s2204_s23, 0 }
  0x48   : > { %s1962_s28 = scalar_lea.hbm %s2188_s6, %s1886_s18  ;;  %s1267_s24 = sshll.u32 %s349_s16, 2 }
  0x49   : > { %p1954_p10 = por %p218_p11, %p2217_p13  ;;  %p2219_p6 = scmp.lt.s32.totalorder %s1713_s15, 2 }
  0x4a   : > { %s353_s0 = scalar_lea.vmem [#allocation9], %s1267_s24  ;;  %s350_s21 = scalar_lea.sflag [#allocation10], %s349_s16 }
  0x4b   : > { %s2218_s20 = scalar_select %p1954_p10, 1, 0 }
  0x4c   : > { %p1966_p4 = pnand %p2219_p6, %p214_p9  ;;  %s369_s23 = sshll.u32 %s353_s0, 4  ;;  %s1970_s23 = int_to_ptr.vmem [resolvable:$true] %s369_s23 }
  0x4d   : > { %s1549_s14 = scalar_lea.hbm %s1962_s28, 64  ;;  %s1554_s9 = scalar_lea.hbm %s2188_s6, 128 }
  0x4e   : > { %p1550_p1 = scmp.ne.s32.totalorder %s1962_s28, %s1549_s14  ;;  %p1551_p3 = pneg %p1966_p4 }
  0x4f   : > { %p1555_p5 = scmp.lt.u32.totalorder %s1962_s28, %s2188_s6  ;;  %p1556_p12 = scmp.lt.u32.totalorder %s1554_s9, %s1549_s14 }
  0x50   : > { %p1552_p8 = pnand %p1551_p3, %p1550_p1  ;;  %p1558_p9 = scmp.lt.u32.totalorder %s1549_s14, %s1962_s28 }
  0x51   : > { %p1557_p0 = por %p1556_p12, %p1555_p5 }
  0x52   : > { %p1553_p2 = pneg %p1552_p8 }
  0x53   : > { %p1559_p11 = por %p1558_p9, %p1557_p0 }
  0x55   : > { %p1560_p13 = pnand %p1559_p11, %p1553_p2 }
  0x57   : > { %1563 = shalt.err (!%p1560_p13)
}
  0x58   : > { %s1564_s16 = scalar_lea.vmem %s1970_s23, 64  ;;  %s1716_s24 = smov [#allocation9]  }
  0x59   : > { %p1565_p6 = scmp.ne.s32.totalorder %s1970_s23, %s1564_s16  ;;  %s1569_s0 = sshll.u32 %s1716_s24, 4  ;;  %s1570_s0 = int_to_ptr.vmem [resolvable:$false] %s1569_s0 }
  0x5a   : > { %s1571_s4 = scalar_lea.vmem %s1570_s0, 128  ;;  %p1572_p10 = scmp.lt.s32.totalorder %s1970_s23, %s1570_s0 }
  0x5b   : > { %p1567_p1 = pnand %p1565_p6, %p1551_p3  ;;  %p1573_p5 = scmp.lt.s32.totalorder %s1571_s4, %s1564_s16 }
  0x5d   : > { %p1568_p8 = pneg %p1567_p1  ;;  %p1574_p12 = por %p1573_p5, %p1572_p10 }
  0x5f   : > { %p1575_p0 = pnand %p1574_p12, %p1568_p8 }
  0x61   : > { %1578 = shalt.err (!%p1575_p0)
}
  0x62   : > { %1413 = dma.hbm_to_vmem [thread:$0]  (!%p1966_p4), %s1962_s28, 64, %s1970_s23, %s350_s21  }
  0x63   : > { %378 = sbr.rel (%p1935_p7) target bundleno = 611 (0x263), region = 36  ;;  %s380_s14 = sand.u32 (!%p1935_p7), 1, %s1697_s2  }
  0x64   : > { %s1270_s18 = sshll.u32 (!%p1935_p7), %s380_s14, 2  ;;  %s381_s22 = scalar_lea.sflag (!%p1935_p7), [#allocation7], %s380_s14 }
  0x65   : > { %s384_s9 = scalar_lea.vmem (!%p1935_p7), [#allocation6], %s1270_s18  ;;  %p2221_p3 = scmp.ne.s32.totalorder (!%p1935_p7), %s2206_s25, 0 }
  0x6a   : > { %1656 = dma.done.wait (%p2221_p3), %s381_s22, 64  }
  0x6b   : > { %1658 = vsyncadd (%p2221_p3), %s381_s22, 4294967232  ;;  %s389_s27 = sand.u32 1, %s1685_s10   ;;  %p2222_p10 = scmp.ne.s32.totalorder %s2218_s20, 0 }
  0x6c   : > { %s1271_s17 = sshll.u32 %s389_s27, 2  ;;  %s390_s16 = scalar_lea.sflag [#allocation10], %s389_s27 }
  0x6d   : > { %s393_s28 = scalar_lea.vmem [#allocation9], %s1271_s17 }
  0x6e   : > { %1660 = dma.done.wait (%p2222_p10), %s390_s16, 64  }
  0x6f   : > { %1662 = vsyncadd (%p2222_p10), %s390_s16, 4294967232  ;;  %s460_s19 = sld [smem:[#allocation3]]  ;;  %p461_p7 = scmp.lt.s32.totalorder %s1705_s13, 1  ;;  %v536_v1 = vld [vmem:[%s384_s9] sm:$0xf]  ;;  %vm618_vm0 = vcmask 1043456  }
  0x70   : > { %1349 = vmatprep.subr.msk.mxu0 %vm618_vm0, %v536_v1  ;;  %v768_v3 = vld [vmem:[%s393_s28] sm:$0xf]  ;;  %vm569_vm1 = vcmask 31744   ;;  %s1036_s22 = sld [smem:[#allocation5]]  ;;  %s450_s27 = sand.u32 1, %s1673_s8  }
  0x71   : > { %s462_s23 = scalar_select %p461_p7, %s1705_s13, 1  ;;  %1350 = vmatpush3.msk.msra.mxu0 %vm618_vm0, %v536_v1  ;;  %1375 = vmatprep.subr.msk.mxu1 %vm618_vm0, %v768_v3 }
  0x72   : > { %1376 = vmatpush3.msk.msra.mxu1 %vm618_vm0, %v768_v3  ;;  %s1272_s17 = sshll.u32 %s450_s27, 7  ;;  %s1314_s28 = sshll.u32 %s1705_s13, 11 }
  0x73   : > { %s2068_s16 = scalar_lea.vmem [#allocation11], %s1272_s17  ;;  %s2117_s24 = scalar_lea.sflag [#allocation8], %s450_s27 }
  0x74   : > { %p2223_p9 = scmp.ne.s32.totalorder %s2209_s29, 0  ;;  %s1717_s0 = smov [#allocation11]  }
  0x75   : > { %p463_p4 = scmp.lt.s32.totalorder %s460_s19, 0 }
  0x76   : > { %s1037_s9 = scvt.s32.f32 %s1036_s22 }
  0x77   : > { %s2243_s19 = smov (!%p463_p4, %s460_s19), 0 }
  0x78   : > { %s465_s25 = sadd.s32 %s2243_s19, %s462_s23  ;;  %v2062_v55 = vstv %s1037_s9  ;;  %s1119_s19 = sshll.u32 %s2068_s16, 4  ;;  %s2111_s19 = int_to_ptr.vmem [resolvable:$true] %s1119_s19 }
  0x79   : > { %s1273_s21 = sshll.u32 %s465_s25, 2  ;;  %s1579_s13 = scalar_lea.vmem %s2111_s19, 2048 }
  0x7a   : > { %s467_s4 = scalar_lea.vmem %s2185_s3, %s1273_s21  ;;  %s498_s18 = scalar_lea.vmem %s2187_s5, %s1273_s21 }
  0x7b   : > { %v535_v0 = vld [vmem:[%s467_s4] sm:$0xf]  ;;  %s2109_s21 = scalar_lea.hbm %s2189_s7, %s1314_s28  ;;  %p1580_p2 = scmp.ne.s32.totalorder %s2111_s19, %s1579_s13 }
  0x7c   : > { %537 = vxpose.xlu0.b32.start.end [1/1] (short) %v535_v0, 128  ;;  %v767_v2 = vld [vmem:[%s498_s18] sm:$0xf]  ;;  %s1583_s4 = sshll.u32 %s1717_s0, 4  ;;  %s1584_s4 = int_to_ptr.vmem [resolvable:$false] %s1583_s4 }
  0x7d   : > { %p1581_p11 = pnand %p1580_p2, %p2223_p9  ;;  %s1585_s20 = scalar_lea.vmem %s1584_s4, 4096 }
  0x7e   : > { %p1586_p6 = scmp.lt.s32.totalorder %s2111_s19, %s1584_s4  ;;  %p1587_p1 = scmp.lt.s32.totalorder %s1585_s20, %s1579_s13 }
  0x7f   : > { %p1582_p13 = pneg %p1581_p11 }
  0x80   : > { %p1588_p8 = por %p1587_p1, %p1586_p6 }
  0x82   : > { %p1589_p5 = pnand %p1588_p8, %p1582_p13 }
  0xb9   : > { %769 = vxpose.xlu0.b32.start.end [1/1] (short) %v767_v2, 128 }
  0xfc   : > { %v553_v4 = vpop.trf.xlu0 }
  0xfd   : > { %1351 = vmatprep.mubr.msk.f32.mxu0 %vm569_vm1, %v553_v4 }
 0x100   : > { %v554_v5 = vpop.trf.xlu0 }
 0x101   : > { %1352 = vmatmul.mubr.msk.f32.vlgmr.msra.gmra.mrb[0].mxu0 %vm569_vm1, %v554_v5 }
 0x104   : > { %v555_v6 = vpop.trf.xlu0 }
 0x105   : > { %1354 = vmatprep.mubr.msk.f32.mxu0 %vm569_vm1, %v555_v6 }
 0x108   : > { %v556_v7 = vpop.trf.xlu0 }
 0x109   : > { %1355 = vmatmul.mubr.msk.f32.gmra.mrb[2].mxu0 %vm569_vm1, %v556_v7 }
 0x10c   : > { %v557_v8 = vpop.trf.xlu0 }
 0x10d   : > { %1357 = vmatprep.mubr.msk.f32.mxu0 %vm569_vm1, %v557_v8 }
 0x110   : > { %v558_v9 = vpop.trf.xlu0 }
 0x111   : > { %1358 = vmatmul.mubr.msk.f32.gmra.mrb[4].mxu0 %vm569_vm1, %v558_v9 }
 0x114   : > { %v559_v10 = vpop.trf.xlu0 }
 0x115   : > { %1360 = vmatprep.mubr.msk.f32.mxu0 %vm569_vm1, %v559_v10 }
 0x118   : > { %v560_v11 = vpop.trf.xlu0 }
 0x119   : > { %1361 = vmatmul.mubr.msk.f32.gmra.mrb[6].mxu0 %vm569_vm1, %v560_v11 }
 0x11c   : > { %v561_v12 = vpop.trf.xlu0 }
 0x11d   : > { %1363 = vmatprep.mubr.msk.f32.mxu0 %vm569_vm1, %v561_v12 }
 0x120   : > { %v562_v13 = vpop.trf.xlu0 }
 0x121   : > { %1364 = vmatmul.mubr.msk.f32.gmra.mrb[8].mxu0 %vm569_vm1, %v562_v13 }
 0x124   : > { %v563_v14 = vpop.trf.xlu0 }
 0x125   : > { %1366 = vmatprep.mubr.msk.f32.mxu0 %vm569_vm1, %v563_v14 }
 0x128   : > { %v564_v15 = vpop.trf.xlu0 }
 0x129   : > { %1367 = vmatmul.mubr.msk.f32.gmra.mrb[10].mxu0 %vm569_vm1, %v564_v15 }
 0x12c   : > { %v565_v16 = vpop.trf.xlu0 }
 0x12d   : > { %1369 = vmatprep.mubr.msk.f32.mxu0 %vm569_vm1, %v565_v16 }
 0x130   : > { %v566_v17 = vpop.trf.xlu0 }
 0x131   : > { %1370 = vmatmul.mubr.msk.f32.gmra.mrb[12].mxu0 %vm569_vm1, %v566_v17 }
 0x134   : > { %v567_v18 = vpop.trf.xlu0 }
 0x135   : > { %1372 = vmatprep.mubr.msk.f32.mxu0 %vm569_vm1, %v567_v18 }
 0x138   : > { %v568_v19 = vpop.trf.xlu0 }
 0x139   : > { %1373 = vmatmul.mubr.msk.f32.gmra.mrb[14].mxu0 %vm569_vm1, %v568_v19 }
 0x13c   : > { %v785_v20 = vpop.trf.xlu0 }
 0x13d   : > { %1377 = vmatprep.mubr.msk.f32.mxu1 %vm569_vm1, %v785_v20 }
 0x140   : > { %v786_v21 = vpop.trf.xlu0 }
 0x141   : > { %1378 = vmatmul.mubr.msk.f32.vlgmr.msra.gmra.mrb[0].mxu1 %vm569_vm1, %v786_v21 }
 0x144   : > { %v787_v22 = vpop.trf.xlu0 }
 0x145   : > { %1380 = vmatprep.mubr.msk.f32.mxu1 %vm569_vm1, %v787_v22 }
 0x148   : > { %v788_v23 = vpop.trf.xlu0 }
 0x149   : > { %1381 = vmatmul.mubr.msk.f32.gmra.mrb[2].mxu1 %vm569_vm1, %v788_v23 }
 0x14c   : > { %v789_v24 = vpop.trf.xlu0 }
 0x14d   : > { %1383 = vmatprep.mubr.msk.f32.mxu1 %vm569_vm1, %v789_v24 }
 0x150   : > { %v790_v25 = vpop.trf.xlu0 }
 0x151   : > { %1384 = vmatmul.mubr.msk.f32.gmra.mrb[4].mxu1 %vm569_vm1, %v790_v25 }
 0x154   : > { %v791_v26 = vpop.trf.xlu0 }
 0x155   : > { %1386 = vmatprep.mubr.msk.f32.mxu1 %vm569_vm1, %v791_v26 }
 0x158   : > { %v792_v27 = vpop.trf.xlu0 }
 0x159   : > { %1387 = vmatmul.mubr.msk.f32.gmra.mrb[6].mxu1 %vm569_vm1, %v792_v27 }
 0x15c   : > { %v793_v28 = vpop.trf.xlu0 }
 0x15d   : > { %1389 = vmatprep.mubr.msk.f32.mxu1 %vm569_vm1, %v793_v28 }
 0x160   : > { %v794_v29 = vpop.trf.xlu0 }
 0x161   : > { %1390 = vmatmul.mubr.msk.f32.gmra.mrb[8].mxu1 %vm569_vm1, %v794_v29 }
 0x164   : > { %v795_v30 = vpop.trf.xlu0 }
 0x165   : > { %1392 = vmatprep.mubr.msk.f32.mxu1 %vm569_vm1, %v795_v30 }
 0x168   : > { %v796_v31 = vpop.trf.xlu0 }
 0x169   : > { %1393 = vmatmul.mubr.msk.f32.gmra.mrb[10].mxu1 %vm569_vm1, %v796_v31 }
 0x16c   : > { %v797_v32 = vpop.trf.xlu0 }
 0x16d   : > { %1395 = vmatprep.mubr.msk.f32.mxu1 %vm569_vm1, %v797_v32 }
 0x170   : > { %v798_v33 = vpop.trf.xlu0 }
 0x171   : > { %1396 = vmatmul.mubr.msk.f32.gmra.mrb[12].mxu1 %vm569_vm1, %v798_v33 }
 0x174   : > { %v799_v34 = vpop.trf.xlu0 }
 0x175   : > { %1398 = vmatprep.mubr.msk.f32.mxu1 %vm569_vm1, %v799_v34 }
 0x178   : > { %v800_v35 = vpop.trf.xlu0 }
 0x179   : > { %1399 = vmatmul.mubr.msk.f32.gmra.mrb[14].mxu1 %vm569_vm1, %v800_v35 }
 0x1d4   : > { %v1353_v36 = vpop.f32.mrb[0].mxu0 }
 0x1d5   : > { %v688_v37 = vpop.f32.mrb[1].mxu0 }
 0x1dc   : > { %v1356_v38 = vpop.f32.mrb[2].mxu0 }
 0x1dd   : > { %v698_v39 = vpop.f32.mrb[3].mxu0 }
 0x1e4   : > { %v1359_v40 = vpop.f32.mrb[4].mxu0 }
 0x1e5   : > { %v708_v41 = vpop.f32.mrb[5].mxu0 }
 0x1ec   : > { %v1362_v42 = vpop.f32.mrb[6].mxu0 }
 0x1ed   : > { %v718_v43 = vpop.f32.mrb[7].mxu0 }
 0x1f4   : > { %v1365_v44 = vpop.f32.mrb[8].mxu0 }
 0x1f5   : > { %v728_v45 = vpop.f32.mrb[9].mxu0 }
 0x1fc   : > { %v2049_v46 = vpop.f32.mrb[10].mxu0 }
 0x1fd   : > { %v2051_v47 = vpop.f32.mrb[11].mxu0 }
 0x204   : > { %v2053_v48 = vpop.f32.mrb[12].mxu0 }
 0x205   : > { %v2055_v49 = vpop.f32.mrb[13].mxu0 }
 0x20c   : > { %v2057_v50 = vpop.f32.mrb[14].mxu0 }
 0x20d   : > { %v2059_v51 = vpop.f32.mrb[15].mxu0 }
 0x214   : > { %v1379_v52 = vpop.f32.mrb[0].mxu1 }
 0x215   : > { %v998_v53 = vsub.f32 %v1353_v36, %v1379_v52  ;;  %v918_v54 = vpop.f32.mrb[1].mxu1 }
 0x216   : > { %v997_v56 = vsub.f32 %v688_v37, %v918_v54 }
 0x217   : > { %v1014_v57 = vand.u32 2147483647, %v998_v53 }
 0x218   : > { %v1013_v58 = vand.u32 2147483647, %v997_v56 }
 0x219   : > { %v1056_v59 = vmul.f32 %v2062_v55, %v1014_v57 }
 0x21a   : > { %v1055_v60 = vmul.f32 %v2062_v55, %v1013_v58 }
 0x21b   : > { %1088 = vst [vmem:[%s2068_s16 + $0x8] sm:$0xff] %v1056_v59 }
 0x21c   : > { %v1382_v61 = vpop.f32.mrb[2].mxu1  ;;  %1087 = vst [vmem:[%s2068_s16] sm:$0xff] %v1055_v60 }
 0x21d   : > { %v1000_v62 = vsub.f32 %v1356_v38, %v1382_v61  ;;  %v928_v63 = vpop.f32.mrb[3].mxu1 }
 0x21e   : > { %v999_v0 = vsub.f32 %v698_v39, %v928_v63 }
 0x21f   : > { %v1016_v1 = vand.u32 2147483647, %v1000_v62 }
 0x220   : > { %v1015_v2 = vand.u32 2147483647, %v999_v0 }
 0x221   : > { %v1058_v3 = vmul.f32 %v2062_v55, %v1016_v1 }
 0x222   : > { %v1057_v4 = vmul.f32 %v2062_v55, %v1015_v2 }
 0x223   : > { %1090 = vst [vmem:[%s2068_s16 + $0x18] sm:$0xff] %v1058_v3 }
 0x224   : > { %v1385_v5 = vpop.f32.mrb[4].mxu1  ;;  %1089 = vst [vmem:[%s2068_s16 + $0x10] sm:$0xff] %v1057_v4 }
 0x225   : > { %v1002_v6 = vsub.f32 %v1359_v40, %v1385_v5  ;;  %v938_v7 = vpop.f32.mrb[5].mxu1 }
 0x226   : > { %v1001_v8 = vsub.f32 %v708_v41, %v938_v7 }
 0x227   : > { %v1018_v9 = vand.u32 2147483647, %v1002_v6 }
 0x228   : > { %v1017_v10 = vand.u32 2147483647, %v1001_v8 }
 0x229   : > { %v1060_v11 = vmul.f32 %v2062_v55, %v1018_v9 }
 0x22a   : > { %v1059_v12 = vmul.f32 %v2062_v55, %v1017_v10 }
 0x22b   : > { %1092 = vst [vmem:[%s2068_s16 + $0x28] sm:$0xff] %v1060_v11 }
 0x22c   : > { %v1388_v13 = vpop.f32.mrb[6].mxu1  ;;  %1091 = vst [vmem:[%s2068_s16 + $0x20] sm:$0xff] %v1059_v12 }
 0x22d   : > { %v1004_v14 = vsub.f32 %v1362_v42, %v1388_v13  ;;  %v948_v15 = vpop.f32.mrb[7].mxu1 }
 0x22e   : > { %v1003_v16 = vsub.f32 %v718_v43, %v948_v15 }
 0x22f   : > { %v1020_v17 = vand.u32 2147483647, %v1004_v14 }
 0x230   : > { %v1019_v18 = vand.u32 2147483647, %v1003_v16 }
 0x231   : > { %v1062_v19 = vmul.f32 %v2062_v55, %v1020_v17 }
 0x232   : > { %v1061_v20 = vmul.f32 %v2062_v55, %v1019_v18 }
 0x233   : > { %1094 = vst [vmem:[%s2068_s16 + $0x38] sm:$0xff] %v1062_v19 }
 0x234   : > { %v1391_v21 = vpop.f32.mrb[8].mxu1  ;;  %1093 = vst [vmem:[%s2068_s16 + $0x30] sm:$0xff] %v1061_v20 }
 0x235   : > { %v1006_v22 = vsub.f32 %v1365_v44, %v1391_v21  ;;  %v958_v23 = vpop.f32.mrb[9].mxu1 }
 0x236   : > { %v1005_v24 = vsub.f32 %v728_v45, %v958_v23 }
 0x237   : > { %v1022_v25 = vand.u32 2147483647, %v1006_v22 }
 0x238   : > { %v1021_v26 = vand.u32 2147483647, %v1005_v24 }
 0x239   : > { %v1064_v27 = vmul.f32 %v2062_v55, %v1022_v25 }
 0x23a   : > { %v1063_v28 = vmul.f32 %v2062_v55, %v1021_v26 }
 0x23b   : > { %1096 = vst [vmem:[%s2068_s16 + $0x48] sm:$0xff] %v1064_v27 }
 0x23c   : > { %v1394_v29 = vpop.f32.mrb[10].mxu1  ;;  %1095 = vst [vmem:[%s2068_s16 + $0x40] sm:$0xff] %v1063_v28 }
 0x23d   : > { %v1008_v30 = vsub.f32 %v2049_v46, %v1394_v29  ;;  %v968_v31 = vpop.f32.mrb[11].mxu1 }
 0x23e   : > { %v1007_v32 = vsub.f32 %v2051_v47, %v968_v31 }
 0x23f   : > { %v1024_v33 = vand.u32 2147483647, %v1008_v30 }
 0x240   : > { %v1023_v34 = vand.u32 2147483647, %v1007_v32 }
 0x241   : > { %v1066_v35 = vmul.f32 %v2062_v55, %v1024_v33 }
 0x242   : > { %v1065_v36 = vmul.f32 %v2062_v55, %v1023_v34 }
 0x243   : > { %1098 = vst [vmem:[%s2068_s16 + $0x58] sm:$0xff] %v1066_v35 }
 0x244   : > { %v1397_v37 = vpop.f32.mrb[12].mxu1  ;;  %1097 = vst [vmem:[%s2068_s16 + $0x50] sm:$0xff] %v1065_v36 }
 0x245   : > { %v1010_v38 = vsub.f32 %v2053_v48, %v1397_v37  ;;  %v978_v39 = vpop.f32.mrb[13].mxu1 }
 0x246   : > { %v1009_v40 = vsub.f32 %v2055_v49, %v978_v39 }
 0x247   : > { %v1026_v41 = vand.u32 2147483647, %v1010_v38 }
 0x248   : > { %v1025_v42 = vand.u32 2147483647, %v1009_v40 }
 0x249   : > { %v1068_v43 = vmul.f32 %v2062_v55, %v1026_v41 }
 0x24a   : > { %v1067_v44 = vmul.f32 %v2062_v55, %v1025_v42 }
 0x24b   : > { %1100 = vst [vmem:[%s2068_s16 + $0x68] sm:$0xff] %v1068_v43 }
 0x24c   : > { %v1400_v45 = vpop.f32.mrb[14].mxu1  ;;  %1099 = vst [vmem:[%s2068_s16 + $0x60] sm:$0xff] %v1067_v44 }
 0x24d   : > { %v1012_v46 = vsub.f32 %v2057_v50, %v1400_v45  ;;  %v988_v47 = vpop.f32.mrb[15].mxu1 }
 0x24e   : > { %v1011_v48 = vsub.f32 %v2059_v51, %v988_v47 }
 0x24f   : > { %v1028_v52 = vand.u32 2147483647, %v1012_v46 }
 0x250   : > { %v1027_v49 = vand.u32 2147483647, %v1011_v48 }
 0x251   : > { %v1070_v53 = vmul.f32 %v2062_v55, %v1028_v52 }
 0x252   : > { %v1069_v54 = vmul.f32 %v2062_v55, %v1027_v49 }
 0x253   : > { %1102 = vst [vmem:[%s2068_s16 + $0x78] sm:$0xff] %v1070_v53 }
 0x254   : > { %1101 = vst [vmem:[%s2068_s16 + $0x70] sm:$0xff] %v1069_v54 }
 0x255   : > { %1592 = shalt.err (!%p1589_p5)
}
 0x256   : > { %s1593_s14 = scalar_lea.hbm %s2109_s21, 2048  ;;  %s1597_s9 = scalar_lea.hbm %s2189_s7, 4096 }
 0x257   : > { %p1594_p12 = scmp.ne.s32.totalorder %s2109_s21, %s1593_s14  ;;  %p1598_p10 = scmp.lt.u32.totalorder %s2109_s21, %s2189_s7 }
 0x258   : > { %p1599_p7 = scmp.lt.u32.totalorder %s1597_s9, %s1593_s14  ;;  %p1601_p2 = scmp.lt.u32.totalorder %s1593_s14, %s2109_s21 }
 0x259   : > { %p1595_p0 = pnand %p1594_p12, %p2223_p9 }
 0x25a   : > { %p1600_p4 = por %p1599_p7, %p1598_p10 }
 0x25b   : > { %p1596_p3 = pneg %p1595_p0 }
 0x25c   : > { %p1602_p11 = por %p1601_p2, %p1600_p4 }
 0x25e   : > { %p1603_p13 = pnand %p1602_p11, %p1596_p3 }
 0x260   : > { %1606 = shalt.err (!%p1603_p13)
}
 0x261   : > { %s1718_s16 = smov 128   ;;  %s1719_s28 = smov 8  }
 0x262   : > { %1405 = dma.vmem_to_hbm [thread:$0]  (%p2223_p9), %s2111_s19, 2048, %s2109_s21, %s2117_s24, %s1718_s16, %s1718_s16, %s1719_s28  }
 0x263 PF: > { %s1134_s23 = sand.u32 1, %s1669_s30   ;;  %p2224_p6 = scmp.ne.s32.totalorder %s2210_s11, 0 }
 0x264   : > { %p2225_p1 = scmp.ge.s32.totalorder %s1713_s15, 2  ;;  %s1135_s25 = scalar_lea.sflag [#allocation8], %s1134_s23 }
 0x266   : > { %p1415_p8 = pnand %p2225_p1, %p2224_p6 }
 0x268   : > { %1664 = dma.done.wait (!%p1415_p8), %s1135_s25, 2048  }
 0x269   : > { %1666 = vsyncadd (!%p1415_p8), %s1135_s25, 4294965248  ;;  %s29_s15 = sadd.s32 1, %s1713_s15   ;;  %s2226_s13 = sld [smem:[#allocation15_spill]] }
 0x26a   : > { %p26_p5 = scmp.ge.s32.totalorder %s29_s15, 4   ;;  %s2227_s9 = sld [smem:[#allocation18_spill]] }
 0x26b   : > { %s2228_s29 = sld [smem:[#allocation19_spill]]  ;;  %s2229_s19 = sld [smem:[#allocation16_spill]] }
 0x26c   : > { %s2230_s14 = sld [smem:[#allocation17_spill]]  ;;  %s2231_s30 = smov %s1673_s8 }
 0x26d   : > { %s2233_s0 = smov %s1685_s10  ;;  %s2234_s10 = smov %s1689_s1 }
 0x26e   : > { %s2235_s1 = smov %s1945_s26  ;;  %s2236_s11 = smov %s1697_s2 }
 0x26f   : > { %s2232_s8 = smov %s2226_s13  ;;  %s2237_s2 = smov %s1701_s12 }
 0x270   :  { %28 = sbr.rel (!%p26_p5) target bundleno = 16 (0x10), region = 104 }
 0x271   : > { %s2238_s12 = smov %s2228_s29  ;;  %s2239_s13 = smov %s2229_s19 }
 0x277   :  { %1140 = vsyncpa [#allocation7], 1 }
 0x278   :  { %1142 = vsyncpa [#allocation7 + $0x1], 1 }
 0x279   :  { %1143 = vsyncpa [#allocation10], 1 }
 0x27a   :  { %1145 = vsyncpa [#allocation10 + $0x1], 1 }
 0x27b   :  { %1146 = vsyncpa [#allocation8], 1 }
 0x27c   :  { %1148 = vsyncpa [#allocation8 + $0x1], 1 }

</bundles_post_ra>
